<compile_context>
chip_gen: v7x
topology: tpu7x:2x2x1
jax: 0.10.0
libtpu: 0.0.40
codegen_flags: <defaults>
</compile_context>

<pallas_src>
import functools

import jax
import jax.numpy as jnp
from jax.experimental import pallas as pl
from jax.experimental.pallas import tpu as pltpu


def _arm_kernel(x_ref, w1_ref, b1_ref, mask_ref, w2_ref, b2_ref, out_ref,
                acc_ref, *, Lp, Wp, inv_hw):
    # x_ref: (C_in, L_ext) bf16 -- flattened, zero-padded image for one batch
    #        element; output position q reads input positions q + dy*Wp + dx.
    # acc_ref: (Cout, Lp) f32 scratch accumulator.
    acc_ref[...] = jnp.zeros_like(acc_ref)

    # 3x3 conv as 9 accumulating matmuls (bf16 operands, f32 accumulation).
    for t in range(9):
        dy, dx = divmod(t, 3)
        s = dy * Wp + dx                       # static lane offset of this tap
        acc_ref[...] += jnp.dot(w1_ref[t], x_ref[:, s:s + Lp],
                                preferred_element_type=jnp.float32)

    # Folded BN (scale already in the weights) bias + ReLU.
    fuse = jnp.maximum(acc_ref[...] + b1_ref[...], 0.0)        # (Cout, Lp) f32

    # Global average pool over valid (interior) positions: masked XLU lane
    # reduction (keeps the MXU off the serial N=1 path).
    gap = jnp.sum(fuse * mask_ref[...], axis=-1, keepdims=True) * inv_hw

    # 1x1 attention conv (scale folded into w2) + bias + Sigmoid -> (Cout, 1).
    att = jnp.dot(w2_ref[...], gap.astype(w2_ref.dtype),
                  preferred_element_type=jnp.float32)
    att = jax.nn.sigmoid(att + b2_ref[...])

    # out = fuse * att (att broadcast over the lane axis); lane-dense store.
    out_ref[...] = (fuse * att).astype(out_ref.dtype)


def attention_refinement_module(x, params):
    """x: NCHW float array.  params: dict from make_params (folded eval BN)."""
    N, C_in, H, W = x.shape
    Cout = params["w1"].shape[0]
    Hp, Wp = H + 2, W + 2          # conv padding = 1
    Lq = H * Wp                    # shifted flat length covering all real pixels
    Lp = ((Lq + 127) // 128) * 128 # lane-dense (multiple of 128) output length

    # One wrapper pad: rows (1, 1+k), cols (1, 1).  Flattened, the buffer is the
    # standard Hp x Wp padded image followed by k extra zero rows, which covers
    # the largest tap window start (2*Wp + 2) plus the lane padding (Lp - Lq).
    k = -(-(Lp - Lq + 2) // Wp)                # ceil((Lp - Lq + 2) / Wp)
    L_ext = (H + 2 + k) * Wp
    xe = jnp.pad(x.astype(jnp.bfloat16),
                 ((0, 0), (0, 0), (1, 1 + k), (1, 1))).reshape(N, C_in, L_ext)

    # Fold BN1 scale into the 3x3 weights; per-tap layout (9, Cout, C_in), bf16.
    w1f = params["w1"] * params["bn1_scale"][:, None, None, None]
    w1_taps = jnp.transpose(w1f, (2, 3, 0, 1)).reshape(9, Cout, C_in)
    w1_taps = w1_taps.astype(jnp.bfloat16)
    b1 = params["bn1_bias"].reshape(Cout, 1).astype(jnp.float32)

    # Fold BN2 scale into the 1x1 weights.
    w2 = (params["w2"] * params["bn2_scale"][:, None]).astype(jnp.bfloat16)
    b2 = params["bn2_bias"].reshape(Cout, 1).astype(jnp.float32)

    # 0/1 row mask of valid interior positions in the shifted flat coordinates
    # (q = (i-1)*Wp + (j-1) for interior pixels), zero on junk cols / lane pad.
    mask2d = jnp.zeros((H, Wp), jnp.float32).at[:, :W].set(1.0)
    mask = jnp.pad(mask2d.reshape(1, Lq), ((0, 0), (0, Lp - Lq)))

    kernel = functools.partial(_arm_kernel, Lp=Lp, Wp=Wp,
                               inv_hw=1.0 / float(H * W))

    out_flat = pl.pallas_call(
        kernel,
        out_shape=jax.ShapeDtypeStruct((N, Cout, Lp), jnp.float32),
        grid_spec=pltpu.PrefetchScalarGridSpec(
            num_scalar_prefetch=0,
            grid=(N,),
            in_specs=[
                pl.BlockSpec((None, C_in, L_ext), lambda n: (n, 0, 0)),
                pl.BlockSpec((9, Cout, C_in), lambda n: (0, 0, 0)),
                pl.BlockSpec((Cout, 1), lambda n: (0, 0)),
                pl.BlockSpec((1, Lp), lambda n: (0, 0)),
                pl.BlockSpec((Cout, Cout), lambda n: (0, 0)),
                pl.BlockSpec((Cout, 1), lambda n: (0, 0)),
            ],
            out_specs=pl.BlockSpec((None, Cout, Lp), lambda n: (n, 0, 0)),
            scratch_shapes=[pltpu.VMEM((Cout, Lp), jnp.float32)],
        ),
        compiler_params=pltpu.CompilerParams(
            dimension_semantics=("parallel",),     # batch steps shard across TCs
            vmem_limit_bytes=32 * 1024 * 1024,
        ),
    )(xe, w1_taps, b1, mask, w2, b2)

    # (N, Cout, Lp) -> NCHW: drop lane padding + the two junk cols per row.
    return out_flat[:, :, :Lq].reshape(N, Cout, H, Wp)[:, :, :, :W]


def make_params(key, in_channels, out_channels):
    """Deterministic synthetic parameters (conv weights + folded eval-mode BN)."""
    ks = jax.random.split(key, 10)
    eps = 1e-5
    # conv_layer: 3x3 conv, in_channels -> out_channels, no bias (BN follows)
    w1 = jax.random.normal(ks[0], (out_channels, in_channels, 3, 3), jnp.float32) * 0.1
    g1 = 1.0 + 0.1 * jax.random.normal(ks[1], (out_channels,), jnp.float32)
    be1 = 0.1 * jax.random.normal(ks[2], (out_channels,), jnp.float32)
    mu1 = 0.1 * jax.random.normal(ks[3], (out_channels,), jnp.float32)
    var1 = jnp.abs(jax.random.normal(ks[4], (out_channels,), jnp.float32)) + 0.5
    s1 = g1 / jnp.sqrt(var1 + eps)
    b1 = be1 - mu1 * s1
    # atten_conv_layer: 1x1 conv, out_channels -> out_channels, no bias, then BN
    w2 = jax.random.normal(ks[5], (out_channels, out_channels), jnp.float32) * 0.1
    g2 = 1.0 + 0.1 * jax.random.normal(ks[6], (out_channels,), jnp.float32)
    be2 = 0.1 * jax.random.normal(ks[7], (out_channels,), jnp.float32)
    mu2 = 0.1 * jax.random.normal(ks[8], (out_channels,), jnp.float32)
    var2 = jnp.abs(jax.random.normal(ks[9], (out_channels,), jnp.float32)) + 0.5
    s2 = g2 / jnp.sqrt(var2 + eps)
    b2 = be2 - mu2 * s2
    return {"w1": w1, "bn1_scale": s1, "bn1_bias": b1,
            "w2": w2, "bn2_scale": s2, "bn2_bias": b2}


def reference_arm(x, params):
    """Pure-JAX f32 reference mirroring the PyTorch forward (eval-mode BN)."""
    s1 = params["bn1_scale"][None, :, None, None]
    b1 = params["bn1_bias"][None, :, None, None]
    s2 = params["bn2_scale"][None, :, None, None]
    b2 = params["bn2_bias"][None, :, None, None]
    z = jax.lax.conv_general_dilated(
        x, params["w1"], window_strides=(1, 1), padding=((1, 1), (1, 1)),
        dimension_numbers=("NCHW", "OIHW", "NCHW"),
        precision=jax.lax.Precision.HIGHEST)
    fuse = jnp.maximum(z * s1 + b1, 0.0)
    gap = jnp.mean(fuse, axis=(2, 3), keepdims=True)          # (N, Cout, 1, 1)
    att = jnp.einsum("oc,nchw->nohw", params["w2"], gap,
                     precision=jax.lax.Precision.HIGHEST)
    att = jax.nn.sigmoid(att * s2 + b2)
    return fuse * att                                         # NCHW


if __name__ == "__main__":
    key = jax.random.PRNGKey(0)
    k_x, k_p = jax.random.split(key)

    N, C_in, Cout, H, W = 2, 8, 16, 16, 16
    x = jax.random.normal(k_x, (N, C_in, H, W), jnp.float32)
    params = make_params(k_p, C_in, Cout)

    out = attention_refinement_module(x, params)
    out = jax.block_until_ready(out)

    ref = reference_arm(x, params)
    assert out.shape == (N, Cout, H, W)
    # bf16 MXU operands vs f32 HIGHEST reference -> loosened tolerance.
    assert jnp.allclose(out, ref, atol=3e-2, rtol=3e-2)

    print("KERNEL_OK")
</pallas_src>

<mosaic_0001>
module attributes {stable_mosaic.version = 11 : i64} {
  func.func @_arm_kernel(%arg0: i32, %arg1: memref<1x8x432xbf16, #tpu.memory_space<vmem>>, %arg2: memref<9x16x8xbf16, #tpu.memory_space<vmem>>, %arg3: memref<16x1xf32, #tpu.memory_space<vmem>>, %arg4: memref<1x384xf32, #tpu.memory_space<vmem>>, %arg5: memref<16x16xbf16, #tpu.memory_space<vmem>>, %arg6: memref<16x1xf32, #tpu.memory_space<vmem>>, %arg7: memref<1x16x384xf32, #tpu.memory_space<vmem>>, %arg8: memref<16x384xf32, #tpu.memory_space<vmem>>) attributes {dimension_semantics = [#tpu.dimension_semantics<parallel>], iteration_bounds = array<i64: 2>, scalar_prefetch = 0 : i64, scratch_operands = 1 : i64, tpu.core_type = #tpu.core_type<tc>, window_params = [{transform_indices = @transform_0, window_bounds = array<i64: 1, 8, 432>}, {pipeline_mode = #tpu.pipeline_mode<synchronous>, transform_indices = @transform_1, window_bounds = array<i64: 9, 16, 8>}, {pipeline_mode = #tpu.pipeline_mode<synchronous>, transform_indices = @transform_2, window_bounds = array<i64: 16, 1>}, {pipeline_mode = #tpu.pipeline_mode<synchronous>, transform_indices = @transform_3, window_bounds = array<i64: 1, 384>}, {pipeline_mode = #tpu.pipeline_mode<synchronous>, transform_indices = @transform_4, window_bounds = array<i64: 16, 16>}, {pipeline_mode = #tpu.pipeline_mode<synchronous>, transform_indices = @transform_5, window_bounds = array<i64: 16, 1>}, {transform_indices = @transform_6, window_bounds = array<i64: 1, 16, 384>}]} {
    %cst = arith.constant 0.000000e+00 : f32
    %0 = vector.broadcast %cst : f32 to vector<16x384xf32>
    %c0 = arith.constant 0 : index
    %c0_0 = arith.constant 0 : index
    %1 = vector.load %arg8[%c0, %c0_0] : memref<16x384xf32, #tpu.memory_space<vmem>>, vector<16x384xf32>
    tpu.vector_store %arg8[%c0, %c0_0], %0 {strides = array<i32>} : memref<16x384xf32, #tpu.memory_space<vmem>>, vector<16x384xf32>,
    %c0_1 = arith.constant 0 : index
    %c0_2 = arith.constant 0 : index
    %2 = vector.load %arg8[%c0_1, %c0_2] : memref<16x384xf32, #tpu.memory_space<vmem>>, vector<16x384xf32>
    %c0_3 = arith.constant 0 : index
    %c0_4 = arith.constant 0 : index
    %c0_5 = arith.constant 0 : index
    %3 = vector.load %arg2[%c0_3, %c0_4, %c0_5] : memref<9x16x8xbf16, #tpu.memory_space<vmem>>, vector<1x16x8xbf16>
    %4 = vector.shape_cast %3 : vector<1x16x8xbf16> to vector<16x8xbf16>
    %c0_6 = arith.constant 0 : index
    %c0_7 = arith.constant 0 : index
    %c0_8 = arith.constant 0 : index
    %5 = vector.load %arg1[%c0_6, %c0_7, %c0_8] : memref<1x8x432xbf16, #tpu.memory_space<vmem>>, vector<1x8x384xbf16>
    %6 = vector.shape_cast %5 : vector<1x8x384xbf16> to vector<8x384xbf16>
    %cst_9 = arith.constant dense<0.000000e+00> : vector<16x384xf32>
    %7 = tpu.matmul %4, %6, %cst_9 {dimension_numbers = #tpu.dot_dimension_numbers<[1], [0], [0], [1], [0, 0, 1, 1], [], []>} : vector<16x8xbf16>, vector<8x384xbf16>, vector<16x384xf32> -> vector<16x384xf32>
    %8 = arith.addf %2, %7 : vector<16x384xf32>
    %c0_10 = arith.constant 0 : index
    %c0_11 = arith.constant 0 : index
    %9 = vector.load %arg8[%c0_10, %c0_11] : memref<16x384xf32, #tpu.memory_space<vmem>>, vector<16x384xf32>
    tpu.vector_store %arg8[%c0_10, %c0_11], %8 {strides = array<i32>} : memref<16x384xf32, #tpu.memory_space<vmem>>, vector<16x384xf32>,
    %c0_12 = arith.constant 0 : index
    %c0_13 = arith.constant 0 : index
    %10 = vector.load %arg8[%c0_12, %c0_13] : memref<16x384xf32, #tpu.memory_space<vmem>>, vector<16x384xf32>
    %c1 = arith.constant 1 : index
    %c0_14 = arith.constant 0 : index
    %c0_15 = arith.constant 0 : index
    %11 = vector.load %arg2[%c1, %c0_14, %c0_15] : memref<9x16x8xbf16, #tpu.memory_space<vmem>>, vector<1x16x8xbf16>
    %12 = vector.shape_cast %11 : vector<1x16x8xbf16> to vector<16x8xbf16>
    %c0_16 = arith.constant 0 : index
    %c0_17 = arith.constant 0 : index
    %c1_18 = arith.constant 1 : index
    %13 = vector.load %arg1[%c0_16, %c0_17, %c1_18] : memref<1x8x432xbf16, #tpu.memory_space<vmem>>, vector<1x8x384xbf16>
    %14 = vector.shape_cast %13 : vector<1x8x384xbf16> to vector<8x384xbf16>
    %cst_19 = arith.constant dense<0.000000e+00> : vector<16x384xf32>
    %15 = tpu.matmul %12, %14, %cst_19 {dimension_numbers = #tpu.dot_dimension_numbers<[1], [0], [0], [1], [0, 0, 1, 1], [], []>} : vector<16x8xbf16>, vector<8x384xbf16>, vector<16x384xf32> -> vector<16x384xf32>
    %16 = arith.addf %10, %15 : vector<16x384xf32>
    %c0_20 = arith.constant 0 : index
    %c0_21 = arith.constant 0 : index
    %17 = vector.load %arg8[%c0_20, %c0_21] : memref<16x384xf32, #tpu.memory_space<vmem>>, vector<16x384xf32>
    tpu.vector_store %arg8[%c0_20, %c0_21], %16 {strides = array<i32>} : memref<16x384xf32, #tpu.memory_space<vmem>>, vector<16x384xf32>,
    %c0_22 = arith.constant 0 : index
    %c0_23 = arith.constant 0 : index
    %18 = vector.load %arg8[%c0_22, %c0_23] : memref<16x384xf32, #tpu.memory_space<vmem>>, vector<16x384xf32>
    %c2 = arith.constant 2 : index
    %c0_24 = arith.constant 0 : index
    %c0_25 = arith.constant 0 : index
    %19 = vector.load %arg2[%c2, %c0_24, %c0_25] : memref<9x16x8xbf16, #tpu.memory_space<vmem>>, vector<1x16x8xbf16>
    %20 = vector.shape_cast %19 : vector<1x16x8xbf16> to vector<16x8xbf16>
    %c0_26 = arith.constant 0 : index
    %c0_27 = arith.constant 0 : index
    %c2_28 = arith.constant 2 : index
    %21 = vector.load %arg1[%c0_26, %c0_27, %c2_28] : memref<1x8x432xbf16, #tpu.memory_space<vmem>>, vector<1x8x384xbf16>
    %22 = vector.shape_cast %21 : vector<1x8x384xbf16> to vector<8x384xbf16>
    %cst_29 = arith.constant dense<0.000000e+00> : vector<16x384xf32>
    %23 = tpu.matmul %20, %22, %cst_29 {dimension_numbers = #tpu.dot_dimension_numbers<[1], [0], [0], [1], [0, 0, 1, 1], [], []>} : vector<16x8xbf16>, vector<8x384xbf16>, vector<16x384xf32> -> vector<16x384xf32>
    %24 = arith.addf %18, %23 : vector<16x384xf32>
    %c0_30 = arith.constant 0 : index
    %c0_31 = arith.constant 0 : index
    %25 = vector.load %arg8[%c0_30, %c0_31] : memref<16x384xf32, #tpu.memory_space<vmem>>, vector<16x384xf32>
    tpu.vector_store %arg8[%c0_30, %c0_31], %24 {strides = array<i32>} : memref<16x384xf32, #tpu.memory_space<vmem>>, vector<16x384xf32>,
    %c0_32 = arith.constant 0 : index
    %c0_33 = arith.constant 0 : index
    %26 = vector.load %arg8[%c0_32, %c0_33] : memref<16x384xf32, #tpu.memory_space<vmem>>, vector<16x384xf32>
    %c3 = arith.constant 3 : index
    %c0_34 = arith.constant 0 : index
    %c0_35 = arith.constant 0 : index
    %27 = vector.load %arg2[%c3, %c0_34, %c0_35] : memref<9x16x8xbf16, #tpu.memory_space<vmem>>, vector<1x16x8xbf16>
    %28 = vector.shape_cast %27 : vector<1x16x8xbf16> to vector<16x8xbf16>
    %c0_36 = arith.constant 0 : index
    %c0_37 = arith.constant 0 : index
    %c18 = arith.constant 18 : index
    %29 = vector.load %arg1[%c0_36, %c0_37, %c18] : memref<1x8x432xbf16, #tpu.memory_space<vmem>>, vector<1x8x384xbf16>
    %30 = vector.shape_cast %29 : vector<1x8x384xbf16> to vector<8x384xbf16>
    %cst_38 = arith.constant dense<0.000000e+00> : vector<16x384xf32>
    %31 = tpu.matmul %28, %30, %cst_38 {dimension_numbers = #tpu.dot_dimension_numbers<[1], [0], [0], [1], [0, 0, 1, 1], [], []>} : vector<16x8xbf16>, vector<8x384xbf16>, vector<16x384xf32> -> vector<16x384xf32>
    %32 = arith.addf %26, %31 : vector<16x384xf32>
    %c0_39 = arith.constant 0 : index
    %c0_40 = arith.constant 0 : index
    %33 = vector.load %arg8[%c0_39, %c0_40] : memref<16x384xf32, #tpu.memory_space<vmem>>, vector<16x384xf32>
    tpu.vector_store %arg8[%c0_39, %c0_40], %32 {strides = array<i32>} : memref<16x384xf32, #tpu.memory_space<vmem>>, vector<16x384xf32>,
    %c0_41 = arith.constant 0 : index
    %c0_42 = arith.constant 0 : index
    %34 = vector.load %arg8[%c0_41, %c0_42] : memref<16x384xf32, #tpu.memory_space<vmem>>, vector<16x384xf32>
    %c4 = arith.constant 4 : index
    %c0_43 = arith.constant 0 : index
    %c0_44 = arith.constant 0 : index
    %35 = vector.load %arg2[%c4, %c0_43, %c0_44] : memref<9x16x8xbf16, #tpu.memory_space<vmem>>, vector<1x16x8xbf16>
    %36 = vector.shape_cast %35 : vector<1x16x8xbf16> to vector<16x8xbf16>
    %c0_45 = arith.constant 0 : index
    %c0_46 = arith.constant 0 : index
    %c19 = arith.constant 19 : index
    %37 = vector.load %arg1[%c0_45, %c0_46, %c19] : memref<1x8x432xbf16, #tpu.memory_space<vmem>>, vector<1x8x384xbf16>
    %38 = vector.shape_cast %37 : vector<1x8x384xbf16> to vector<8x384xbf16>
    %cst_47 = arith.constant dense<0.000000e+00> : vector<16x384xf32>
    %39 = tpu.matmul %36, %38, %cst_47 {dimension_numbers = #tpu.dot_dimension_numbers<[1], [0], [0], [1], [0, 0, 1, 1], [], []>} : vector<16x8xbf16>, vector<8x384xbf16>, vector<16x384xf32> -> vector<16x384xf32>
    %40 = arith.addf %34, %39 : vector<16x384xf32>
    %c0_48 = arith.constant 0 : index
    %c0_49 = arith.constant 0 : index
    %41 = vector.load %arg8[%c0_48, %c0_49] : memref<16x384xf32, #tpu.memory_space<vmem>>, vector<16x384xf32>
    tpu.vector_store %arg8[%c0_48, %c0_49], %40 {strides = array<i32>} : memref<16x384xf32, #tpu.memory_space<vmem>>, vector<16x384xf32>,
    %c0_50 = arith.constant 0 : index
    %c0_51 = arith.constant 0 : index
    %42 = vector.load %arg8[%c0_50, %c0_51] : memref<16x384xf32, #tpu.memory_space<vmem>>, vector<16x384xf32>
    %c5 = arith.constant 5 : index
    %c0_52 = arith.constant 0 : index
    %c0_53 = arith.constant 0 : index
    %43 = vector.load %arg2[%c5, %c0_52, %c0_53] : memref<9x16x8xbf16, #tpu.memory_space<vmem>>, vector<1x16x8xbf16>
    %44 = vector.shape_cast %43 : vector<1x16x8xbf16> to vector<16x8xbf16>
    %c0_54 = arith.constant 0 : index
    %c0_55 = arith.constant 0 : index
    %c20 = arith.constant 20 : index
    %45 = vector.load %arg1[%c0_54, %c0_55, %c20] : memref<1x8x432xbf16, #tpu.memory_space<vmem>>, vector<1x8x384xbf16>
    %46 = vector.shape_cast %45 : vector<1x8x384xbf16> to vector<8x384xbf16>
    %cst_56 = arith.constant dense<0.000000e+00> : vector<16x384xf32>
    %47 = tpu.matmul %44, %46, %cst_56 {dimension_numbers = #tpu.dot_dimension_numbers<[1], [0], [0], [1], [0, 0, 1, 1], [], []>} : vector<16x8xbf16>, vector<8x384xbf16>, vector<16x384xf32> -> vector<16x384xf32>
    %48 = arith.addf %42, %47 : vector<16x384xf32>
    %c0_57 = arith.constant 0 : index
    %c0_58 = arith.constant 0 : index
    %49 = vector.load %arg8[%c0_57, %c0_58] : memref<16x384xf32, #tpu.memory_space<vmem>>, vector<16x384xf32>
    tpu.vector_store %arg8[%c0_57, %c0_58], %48 {strides = array<i32>} : memref<16x384xf32, #tpu.memory_space<vmem>>, vector<16x384xf32>,
    %c0_59 = arith.constant 0 : index
    %c0_60 = arith.constant 0 : index
    %50 = vector.load %arg8[%c0_59, %c0_60] : memref<16x384xf32, #tpu.memory_space<vmem>>, vector<16x384xf32>
    %c6 = arith.constant 6 : index
    %c0_61 = arith.constant 0 : index
    %c0_62 = arith.constant 0 : index
    %51 = vector.load %arg2[%c6, %c0_61, %c0_62] : memref<9x16x8xbf16, #tpu.memory_space<vmem>>, vector<1x16x8xbf16>
    %52 = vector.shape_cast %51 : vector<1x16x8xbf16> to vector<16x8xbf16>
    %c0_63 = arith.constant 0 : index
    %c0_64 = arith.constant 0 : index
    %c36 = arith.constant 36 : index
    %53 = vector.load %arg1[%c0_63, %c0_64, %c36] : memref<1x8x432xbf16, #tpu.memory_space<vmem>>, vector<1x8x384xbf16>
    %54 = vector.shape_cast %53 : vector<1x8x384xbf16> to vector<8x384xbf16>
    %cst_65 = arith.constant dense<0.000000e+00> : vector<16x384xf32>
    %55 = tpu.matmul %52, %54, %cst_65 {dimension_numbers = #tpu.dot_dimension_numbers<[1], [0], [0], [1], [0, 0, 1, 1], [], []>} : vector<16x8xbf16>, vector<8x384xbf16>, vector<16x384xf32> -> vector<16x384xf32>
    %56 = arith.addf %50, %55 : vector<16x384xf32>
    %c0_66 = arith.constant 0 : index
    %c0_67 = arith.constant 0 : index
    %57 = vector.load %arg8[%c0_66, %c0_67] : memref<16x384xf32, #tpu.memory_space<vmem>>, vector<16x384xf32>
    tpu.vector_store %arg8[%c0_66, %c0_67], %56 {strides = array<i32>} : memref<16x384xf32, #tpu.memory_space<vmem>>, vector<16x384xf32>,
    %c0_68 = arith.constant 0 : index
    %c0_69 = arith.constant 0 : index
    %58 = vector.load %arg8[%c0_68, %c0_69] : memref<16x384xf32, #tpu.memory_space<vmem>>, vector<16x384xf32>
    %c7 = arith.constant 7 : index
    %c0_70 = arith.constant 0 : index
    %c0_71 = arith.constant 0 : index
    %59 = vector.load %arg2[%c7, %c0_70, %c0_71] : memref<9x16x8xbf16, #tpu.memory_space<vmem>>, vector<1x16x8xbf16>
    %60 = vector.shape_cast %59 : vector<1x16x8xbf16> to vector<16x8xbf16>
    %c0_72 = arith.constant 0 : index
    %c0_73 = arith.constant 0 : index
    %c37 = arith.constant 37 : index
    %61 = vector.load %arg1[%c0_72, %c0_73, %c37] : memref<1x8x432xbf16, #tpu.memory_space<vmem>>, vector<1x8x384xbf16>
    %62 = vector.shape_cast %61 : vector<1x8x384xbf16> to vector<8x384xbf16>
    %cst_74 = arith.constant dense<0.000000e+00> : vector<16x384xf32>
    %63 = tpu.matmul %60, %62, %cst_74 {dimension_numbers = #tpu.dot_dimension_numbers<[1], [0], [0], [1], [0, 0, 1, 1], [], []>} : vector<16x8xbf16>, vector<8x384xbf16>, vector<16x384xf32> -> vector<16x384xf32>
    %64 = arith.addf %58, %63 : vector<16x384xf32>
    %c0_75 = arith.constant 0 : index
    %c0_76 = arith.constant 0 : index
    %65 = vector.load %arg8[%c0_75, %c0_76] : memref<16x384xf32, #tpu.memory_space<vmem>>, vector<16x384xf32>
    tpu.vector_store %arg8[%c0_75, %c0_76], %64 {strides = array<i32>} : memref<16x384xf32, #tpu.memory_space<vmem>>, vector<16x384xf32>,
    %c0_77 = arith.constant 0 : index
    %c0_78 = arith.constant 0 : index
    %66 = vector.load %arg8[%c0_77, %c0_78] : memref<16x384xf32, #tpu.memory_space<vmem>>, vector<16x384xf32>
    %c8 = arith.constant 8 : index
    %c0_79 = arith.constant 0 : index
    %c0_80 = arith.constant 0 : index
    %67 = vector.load %arg2[%c8, %c0_79, %c0_80] : memref<9x16x8xbf16, #tpu.memory_space<vmem>>, vector<1x16x8xbf16>
    %68 = vector.shape_cast %67 : vector<1x16x8xbf16> to vector<16x8xbf16>
    %c0_81 = arith.constant 0 : index
    %c0_82 = arith.constant 0 : index
    %c38 = arith.constant 38 : index
    %69 = vector.load %arg1[%c0_81, %c0_82, %c38] : memref<1x8x432xbf16, #tpu.memory_space<vmem>>, vector<1x8x384xbf16>
    %70 = vector.shape_cast %69 : vector<1x8x384xbf16> to vector<8x384xbf16>
    %cst_83 = arith.constant dense<0.000000e+00> : vector<16x384xf32>
    %71 = tpu.matmul %68, %70, %cst_83 {dimension_numbers = #tpu.dot_dimension_numbers<[1], [0], [0], [1], [0, 0, 1, 1], [], []>} : vector<16x8xbf16>, vector<8x384xbf16>, vector<16x384xf32> -> vector<16x384xf32>
    %72 = arith.addf %66, %71 : vector<16x384xf32>
    %c0_84 = arith.constant 0 : index
    %c0_85 = arith.constant 0 : index
    %73 = vector.load %arg8[%c0_84, %c0_85] : memref<16x384xf32, #tpu.memory_space<vmem>>, vector<16x384xf32>
    tpu.vector_store %arg8[%c0_84, %c0_85], %72 {strides = array<i32>} : memref<16x384xf32, #tpu.memory_space<vmem>>, vector<16x384xf32>,
    %c0_86 = arith.constant 0 : index
    %c0_87 = arith.constant 0 : index
    %74 = vector.load %arg8[%c0_86, %c0_87] : memref<16x384xf32, #tpu.memory_space<vmem>>, vector<16x384xf32>
    %c0_88 = arith.constant 0 : index
    %c0_89 = arith.constant 0 : index
    %75 = vector.load %arg3[%c0_88, %c0_89] : memref<16x1xf32, #tpu.memory_space<vmem>>, vector<16x1xf32>
    %76 = vector.broadcast %75 : vector<16x1xf32> to vector<16x384xf32>
    %77 = arith.addf %74, %76 : vector<16x384xf32>
    %cst_90 = arith.constant 0.000000e+00 : f32
    %78 = vector.broadcast %cst_90 : f32 to vector<16x384xf32>
    %79 = arith.maximumf %77, %78 : vector<16x384xf32>
    %c0_91 = arith.constant 0 : index
    %c0_92 = arith.constant 0 : index
    %80 = vector.load %arg4[%c0_91, %c0_92] : memref<1x384xf32, #tpu.memory_space<vmem>>, vector<1x384xf32>
    %81 = vector.broadcast %80 : vector<1x384xf32> to vector<16x384xf32>
    %82 = arith.mulf %79, %81 : vector<16x384xf32>
    %cst_93 = arith.constant dense<0.000000e+00> : vector<16xf32>
    %83 = vector.multi_reduction <add>, %82, %cst_93 [1] : vector<16x384xf32> to vector<16xf32>
    %84 = vector.shape_cast %83 : vector<16xf32> to vector<16x1xf32>
    %cst_94 = arith.constant 3.906250e-03 : f32
    %85 = vector.broadcast %cst_94 : f32 to vector<16x1xf32>
    %86 = arith.mulf %84, %85 : vector<16x1xf32>
    %c0_95 = arith.constant 0 : index
    %c0_96 = arith.constant 0 : index
    %87 = vector.load %arg5[%c0_95, %c0_96] : memref<16x16xbf16, #tpu.memory_space<vmem>>, vector<16x16xbf16>
    %88 = arith.truncf %86 : vector<16x1xf32> to vector<16x1xbf16>
    %cst_97 = arith.constant dense<0.000000e+00> : vector<16x1xf32>
    %89 = tpu.matmul %87, %88, %cst_97 {dimension_numbers = #tpu.dot_dimension_numbers<[1], [0], [0], [1], [0, 0, 1, 1], [], []>} : vector<16x16xbf16>, vector<16x1xbf16>, vector<16x1xf32> -> vector<16x1xf32>
    %c0_98 = arith.constant 0 : index
    %c0_99 = arith.constant 0 : index
    %90 = vector.load %arg6[%c0_98, %c0_99] : memref<16x1xf32, #tpu.memory_space<vmem>>, vector<16x1xf32>
    %91 = arith.addf %89, %90 : vector<16x1xf32>
    %92 = arith.negf %91 : vector<16x1xf32>
    %93 = math.exp %92 : vector<16x1xf32>
    %cst_100 = arith.constant 1.000000e+00 : f32
    %94 = vector.broadcast %cst_100 : f32 to vector<16x1xf32>
    %95 = arith.addf %94, %93 : vector<16x1xf32>
    %96 = arith.divf %94, %95 : vector<16x1xf32>
    %97 = vector.broadcast %96 : vector<16x1xf32> to vector<16x384xf32>
    %98 = arith.mulf %79, %97 : vector<16x384xf32>
    %c0_101 = arith.constant 0 : index
    %c0_102 = arith.constant 0 : index
    %c0_103 = arith.constant 0 : index
    %99 = vector.load %arg7[%c0_101, %c0_102, %c0_103] : memref<1x16x384xf32, #tpu.memory_space<vmem>>, vector<1x16x384xf32>
    %100 = vector.shape_cast %99 : vector<1x16x384xf32> to vector<16x384xf32>
    %101 = vector.shape_cast %98 : vector<16x384xf32> to vector<1x16x384xf32>
    tpu.vector_store %arg7[%c0_101, %c0_102, %c0_103], %101 {strides = array<i32>} : memref<1x16x384xf32, #tpu.memory_space<vmem>>, vector<1x16x384xf32>,
    return
  }
  func.func @transform_0(%arg0: i32) -> (i32, i32, i32) {
    %c0_i32 = arith.constant 0 : i32
    %c0_i32_0 = arith.constant 0 : i32
    %c0_i32_1 = arith.constant 0 : i32
    return %arg0, %c0_i32, %c0_i32_0 : i32, i32, i32
  }
  func.func @transform_1(%arg0: i32) -> (i32, i32, i32) {
    %c0_i32 = arith.constant 0 : i32
    %c0_i32_0 = arith.constant 0 : i32
    %c0_i32_1 = arith.constant 0 : i32
    %c0_i32_2 = arith.constant 0 : i32
    return %c0_i32, %c0_i32_0, %c0_i32_1 : i32, i32, i32
  }
  func.func @transform_2(%arg0: i32) -> (i32, i32) {
    %c0_i32 = arith.constant 0 : i32
    %c0_i32_0 = arith.constant 0 : i32
    %c0_i32_1 = arith.constant 0 : i32
    return %c0_i32, %c0_i32_0 : i32, i32
  }
  func.func @transform_3(%arg0: i32) -> (i32, i32) {
    %c0_i32 = arith.constant 0 : i32
    %c0_i32_0 = arith.constant 0 : i32
    %c0_i32_1 = arith.constant 0 : i32
    return %c0_i32, %c0_i32_0 : i32, i32
  }
  func.func @transform_4(%arg0: i32) -> (i32, i32) {
    %c0_i32 = arith.constant 0 : i32
    %c0_i32_0 = arith.constant 0 : i32
    %c0_i32_1 = arith.constant 0 : i32
    return %c0_i32, %c0_i32_0 : i32, i32
  }
  func.func @transform_5(%arg0: i32) -> (i32, i32) {
    %c0_i32 = arith.constant 0 : i32
    %c0_i32_0 = arith.constant 0 : i32
    %c0_i32_1 = arith.constant 0 : i32
    return %c0_i32, %c0_i32_0 : i32, i32
  }
  func.func @transform_6(%arg0: i32) -> (i32, i32, i32) {
    %c0_i32 = arith.constant 0 : i32
    %c0_i32_0 = arith.constant 0 : i32
    %c0_i32_1 = arith.constant 0 : i32
    return %arg0, %c0_i32, %c0_i32_0 : i32, i32, i32
  }
}

</mosaic_0001>

<bundles_post_ra>
// kernel: tpu_custom_call.1
= control target key start
LH: loop header
LB: loop body
LE: loop exit
PB: predicated region body
PF: predicated region fallthrough
CT: control target
= control target key end

     0   :  { %11 = vsyncpa [#allocation4], 0  ;;  %s2467_s0 = inlined_call_operand.vmem [shape: bf16[2,8,432], index: 0, kind: input, shape index: {}]   ;;  %s2468_s1 = inlined_call_operand.vmem [shape: bf16[9,16,8], index: 1, kind: input, shape index: {}]   ;;  %s2469_s2 = inlined_call_operand.vmem [shape: f32[16,1], index: 2, kind: input, shape index: {}]   ;;  %s2470_s3 = inlined_call_operand.vmem [shape: f32[1,384], index: 3, kind: input, shape index: {}]   ;;  %s2471_s4 = inlined_call_operand.vmem [shape: bf16[16,16], index: 4, kind: input, shape index: {}]   ;;  %s2472_s5 = inlined_call_operand.vmem [shape: f32[16,1], index: 5, kind: input, shape index: {}]   ;;  %s2473_s6 = inlined_call_operand.hbm [shape: f32[2,16,384], index: 6, kind: output, shape index: {}]  }
   0x1   :  { %13 = vsyncpa [#allocation4 + $0x1], 0  ;;  %s2191_s21 = smov 0   ;;  %s2193_s22 = smov 0  }
   0x2   :  { %s2195_s23 = smov 0   ;;  %s2197_s24 = smov 0  }
   0x3 LB: > { %s2212_s25 = sadd.s32 4294967295, %s2140_s24   ;;  %s1786_s26 = sadd.s32 4294967294, %s2140_s24   ;;  %s2140_s24 = sphi %s2197_s24, %s2479_s24   ;;  %s2136_s23 = sphi %s2195_s23, %s2478_s23   ;;  %s2132_s22 = sphi %s2193_s22, %s2477_s22   ;;  %s2128_s21 = sphi %s2191_s21, %s2476_s21  }
   0x4   : > { %s2216_s27 = sadd.s32 1, %s2140_s24   ;;  %s157_s28 = sadd.s32 1, %s2136_s23 }
   0x5   : > { %s154_s29 = ssub.s32 %s2140_s24, %s2216_s27  ;;  %p167_p0 = scmp.ne.s32.totalorder %s2136_s23, %s2132_s22 }
   0x6   : > { %p155_p1 = scmp.eq.s32.totalorder %s154_s29, 0  ;;  %p168_p2 = scmp.eq.s32.totalorder %s2212_s25, 1 }
   0x7   : > { %p173_p3 = scmp.ne.s32.totalorder %s2132_s22, %s2128_s21  ;;  %p174_p4 = scmp.eq.s32.totalorder %s1786_s26, 1 }
   0x8   : > { %s2227_s30 = scalar_select %p155_p1, %s2136_s23, %s157_s28  }
   0x9   : > { %p2229_p5 = por %p168_p2, %p167_p0  ;;  %p2233_p6 = por %p174_p4, %p173_p3 }
   0xa   : > { %p1789_p7 = scmp.ge.s32.totalorder %s2140_s24, 1  ;;  %p215_p8 = scmp.lt.s32.totalorder %s2140_s24, 3 }
   0xc   : > { %p216_p9 = pnand %p1789_p7, %p215_p8 }
   0xd   : > { %p245_p10 = scmp.lt.s32.totalorder (!%p216_p9), %s2212_s25, 1  ;;  %v2142_v0 = vmov (!%p216_p9), 0   ;;  %v2143_v1 = vmov (!%p216_p9), 0.0   ;;  %vm284_vm0 = vcmask (!%p216_p9), 1043456   ;;  %v2059_v8 = vld [vmem:[%s2468_s1] sm:$0xff] (!%p216_p9)   ;;  %vm280_vm1 = vcmask (!%p216_p9), 64512  }
   0xe   : > { %219 = sbr.rel (%p216_p9) target bundleno = 998 (0x3e6), region = 44  ;;  %326 = vmatprep.mubr.bf16.mxu0 (!%p216_p9), %v2142_v0  ;;  %2053 = vset.pattern.permute.xlu0 (!%p216_p9), %v2142_v0  ;;  %s2144_s16 = smov (!%p216_p9), 127   ;;  %vm2145_vm2 = vmmov (!%p216_p9), 0   ;;  %v1564_v12 = vld [vmem:[%s2469_s2] sm:$0xff] (!%p216_p9)  ;;  %v1565_v13 = vld [vmem:[%s2469_s2 + $0x8] sm:$0xff] (!%p216_p9)  ;;  %vm424_vm3 = vcmask (!%p216_p9), 1039360  }
   0xf   : > { %2054 = vset.pattern.permute.xlu1 (!%p216_p9), %v2142_v0  ;;  %1907 = vmatprep.subr.bf16.mxu1 (!%p216_p9), %v2143_v1  ;;  %s2146_s17 = smov (!%p216_p9), 126   ;;  %s2147_s18 = smov (!%p216_p9), 110   ;;  %vm570_vm4 = vcmask (!%p216_p9), 1031168   ;;  %v2060_v21 = vld [vmem:[%s2468_s1 + $0x8] sm:$0xff] (!%p216_p9)   ;;  %vm716_vm5 = vcmask (!%p216_p9), 900096   ;;  %v2062_v35 = vld [vmem:[%s2468_s1 + $0x10] sm:$0xff] (!%p216_p9)  }
  0x10   : > { %1909 = vmatprep.mubr.msk.bf16.mxu1 (!%p216_p9), %vm2145_vm2, %v2143_v1  ;;  %s2148_s19 = smov (!%p216_p9), 109   ;;  %s2149_s20 = smov (!%p216_p9), 108   ;;  %vm862_vm6 = vcmask (!%p216_p9), 891904   ;;  %v2063_v49 = vld [vmem:[%s2468_s1 + $0x18] sm:$0xff] (!%p216_p9)   ;;  %vm1008_vm7 = vcmask (!%p216_p9), 883712   ;;  %v2064_v61 = vld [vmem:[%s2468_s1 + $0x20] sm:$0xff] (!%p216_p9)  }
  0x11   : > { %s2150_s26 = smov (!%p216_p9), 92   ;;  %s2151_s28 = smov (!%p216_p9), 91   ;;  %vm1154_vm8 = vcmask (!%p216_p9), 752640   ;;  %vm1300_vm9 = vcmask (!%p216_p9), 744448   ;;  %vm1446_vm10 = vcmask (!%p216_p9), 736256   ;;  %vm1631_vm11 = vcmask (!%p216_p9), 130048  }
  0x12   : > { %s2152_s29 = smov (!%p216_p9), 90   ;;  %s2000_s11 = smul.u32 (!%p216_p9), 768, %s2212_s25 }
  0x15   : > { %s246_s9 = scalar_select %p245_p10, %s2212_s25, 1 }
  0x16   : > { %s2424_s25 = scalar_lea.hbm %s2473_s6, %s2000_s11 }
  0x17   : > { %s1886_s10 = sshll.u32 %s246_s9, 4 }
  0x18   : > { %s249_s13 = scalar_lea.vmem %s2467_s0, %s1886_s10 }
  0x19   : > { %v400_v2 = vld [vmem:[%s249_s13 + $0x8] sm:$0xff]  ;;  %v399_v3 = vld [vmem:[%s249_s13] sm:$0xff] }
  0x1a   : > { %v1804_v4 = vcombine.low %v400_v2, %v400_v2  ;;  %v1802_v5 = vcombine.low %v399_v3, %v399_v3  ;;  %v2061_v6 = vld [vmem:[%s249_s13 + $0x8] ss:$0 sps:$4 sm:$0xff]   ;;  %v1803_v7 = vcombine.high %v399_v3, %v399_v3  ;;  %v1805_v11 = vcombine.high %v400_v2, %v400_v2 }
  0x1b   : > { %v292_v10 = vsel %vm284_vm0, %v2061_v6, 0 }
  0x1c   : > { %420 = vrot.lane.b32.xlu1 %v1804_v4, %s2144_s16  ;;  %416 = vrot.lane.b32.xlu0 %v1802_v5, %s2144_s16  ;;  %v286_v9 = vsel %vm284_vm0, %v1802_v5, 0 }
  0x1d   : > { %1796 = vmatprep.subr.msk.bf16.mxu0 %vm284_vm0, %v1803_v7  ;;  %1908 = vmatpush3.bf16.msra.mxu1 %v292_v10 }
  0x1e   : > { %295 = vmatpush1.bf16.msra.mxu0 %v286_v9  ;;  %1913 = vmatprep.subr.bf16.mxu1 %v2143_v1  ;;  %v2065_v9 = vld [vmem:[%s2468_s1 + $0x28] sm:$0xff]  }
  0x20   : > { %562 = vrot.lane.b32.xlu1 %v1802_v5, %s2146_s17  ;;  %418 = vrot.lane.b32.xlu0 %v1803_v7, %s2144_s16 }
  0x21   : > { %1797 = vmatmul.mubr.msk.bf16.vlgmr.msra.gmra.mrb[0].mxu0 %vm280_vm1, %v2059_v8  ;;  %1910 = vmatmul.mubr.msk.bf16.vlgmr.msra.gmra.mrb[0].mxu1 %vm280_vm1, %v2059_v8 }
  0x22   : > { %472 = vmatprep.mubr.bf16.mxu0 %v2142_v0  ;;  %1915 = vmatprep.mubr.msk.bf16.mxu1 %vm2145_vm2, %v2143_v1 }
  0x24   : > { %566 = vrot.lane.b32.xlu1 %v1804_v4, %s2146_s17  ;;  %564 = vrot.lane.b32.xlu0 %v1803_v7, %s2146_s17 }
  0x28   : > { %710 = vrot.lane.b32.xlu1 %v1803_v7, %s2147_s18  ;;  %708 = vrot.lane.b32.xlu0 %v1802_v5, %s2147_s18 }
  0x2c   : > { %422 = vrot.lane.b32.xlu1 %v1805_v11, %s2144_s16  ;;  %712 = vrot.lane.b32.xlu0 %v1804_v4, %s2147_s18  ;;  %s2153_s16 = smov [#allocation3]  }
  0x30   : > { %856 = vrot.lane.b32.xlu1 %v1803_v7, %s2148_s19  ;;  %854 = vrot.lane.b32.xlu0 %v1802_v5, %s2148_s19 }
  0x34   : > { %568 = vrot.lane.b32.xlu1 %v1805_v11, %s2146_s17  ;;  %858 = vrot.lane.b32.xlu0 %v1804_v4, %s2148_s19  ;;  %s2082_s17 = sshll.u32 %s2153_s16, 4  ;;  %s2083_s17 = int_to_ptr.vmem [resolvable:$false] %s2082_s17 }
  0x38   : > { %714 = vrot.lane.b32.xlu0 %v1805_v11, %s2147_s18  ;;  %1000 = vrot.lane.b32.xlu1 %v1802_v5, %s2149_s20  ;;  %s2084_s18 = scalar_lea.vmem %s2083_s17, 1536 }
  0x3c   : > { %1002 = vrot.lane.b32.xlu0 %v1803_v7, %s2149_s20  ;;  %1004 = vrot.lane.b32.xlu1 %v1804_v4, %s2149_s20 }
  0x40   : > { %860 = vrot.lane.b32.xlu0 %v1805_v11, %s2148_s19  ;;  %1146 = vrot.lane.b32.xlu1 %v1802_v5, %s2150_s26 }
  0x44   : > { %1148 = vrot.lane.b32.xlu0 %v1803_v7, %s2150_s26  ;;  %1150 = vrot.lane.b32.xlu1 %v1804_v4, %s2150_s26 }
  0x48   : > { %1006 = vrot.lane.b32.xlu0 %v1805_v11, %s2149_s20  ;;  %1152 = vrot.lane.b32.xlu1 %v1805_v11, %s2150_s26 }
  0x4c   : > { %1294 = vrot.lane.b32.xlu1 %v1803_v7, %s2151_s28  ;;  %1292 = vrot.lane.b32.xlu0 %v1802_v5, %s2151_s28 }
  0x50   : > { %1298 = vrot.lane.b32.xlu1 %v1805_v11, %s2151_s28  ;;  %1296 = vrot.lane.b32.xlu0 %v1804_v4, %s2151_s28  ;;  %s242_s28 = sand.u32 1, %s2132_s22  }
  0x51   : > { %s2426_s14 = scalar_lea.sflag [#allocation4], %s242_s28 }
  0x54   : > { %1440 = vrot.lane.b32.xlu1 %v1803_v7, %s2152_s29  ;;  %1438 = vrot.lane.b32.xlu0 %v1802_v5, %s2152_s29 }
  0x58   : > { %1444 = vrot.lane.b32.xlu1 %v1805_v11, %s2152_s29  ;;  %1442 = vrot.lane.b32.xlu0 %v1804_v4, %s2152_s29  ;;  %s1999_s29 = smul.u32 48, %s242_s28 }
  0x5a   : > { %s244_s9 = scalar_lea.vmem [#allocation3], %s1999_s29 }
  0x5b   : > { %s1724_s10 = sshll.u32 %s244_s9, 4  ;;  %s2419_s10 = int_to_ptr.vmem [resolvable:$true] %s1724_s10 }
  0x5c   : > { %1568 = vperm.xlu0 %2053, %v1564_v12   ;;  %1573 = vperm.xlu1 %2054, %v1565_v13   ;;  %s2078_s15 = scalar_lea.vmem %s2419_s10, 768  ;;  %p2085_p0 = scmp.lt.s32.totalorder %s2419_s10, %s2083_s17 }
  0x5d   : > { %p2079_p11 = scmp.ne.s32.totalorder %s2419_s10, %s2078_s15  ;;  %p2086_p1 = scmp.lt.s32.totalorder %s2084_s18, %s2078_s15 }
  0x5f   : > { %p2080_p12 = pnand %p2079_p11, %p2229_p5  ;;  %p2087_p2 = por %p2086_p1, %p2085_p0 }
  0x61   : > { %p2081_p13 = pneg %p2080_p12 }
  0x63   : > { %p2088_p3 = pnand %p2087_p2, %p2081_p13 }
  0x8e   : > { %v421_v14 = vpop.permute.xlu1 %420  ;;  %v417_v15 = vpop.permute.xlu0 %416 }
  0x92   : > { %v563_v16 = vpop.permute.xlu1 %562  ;;  %v419_v17 = vpop.permute.xlu0 %418 }
  0x93   : > { %v425_v18 = vsel %vm424_vm3, %v417_v15, %v419_v17  ;;  %v426_v19 = vsel %vm424_vm3, %v419_v17, %v421_v14 }
  0x94   : > { %v432_v20 = vsel %vm284_vm0, %v425_v18, 0  ;;  %1806 = vmatprep.subr.msk.bf16.mxu0 %vm284_vm0, %v426_v19  ;;  %v2066_v19 = vld [vmem:[%s2468_s1 + $0x30] sm:$0xff]  }
  0x95   : > { %441 = vmatpush1.bf16.msra.mxu0 %v432_v20 }
  0x96   : > { %v567_v22 = vpop.permute.xlu1 %566  ;;  %v565_v23 = vpop.permute.xlu0 %564 }
  0x97   : > { %v571_v24 = vsel %vm570_vm4, %v563_v16, %v565_v23  ;;  %v572_v25 = vsel %vm570_vm4, %v565_v23, %v567_v22 }
  0x98   : > { %v578_v26 = vsel %vm284_vm0, %v571_v24, 0  ;;  %1807 = vmatmul.mubr.msk.bf16.vlgmr.msra.gmra.mrb[0].mxu0 %vm280_vm1, %v2060_v21  ;;  %1816 = vmatprep.subr.msk.bf16.mxu0 %vm284_vm0, %v572_v25  ;;  %v2067_v25 = vld [vmem:[%s2468_s1 + $0x38] sm:$0xff]  }
  0x99   : > { %587 = vmatpush1.bf16.msra.mxu0 %v578_v26  ;;  %618 = vmatprep.mubr.bf16.mxu0 %v2142_v0 }
  0x9a   : > { %v711_v27 = vpop.permute.xlu1 %710  ;;  %v709_v28 = vpop.permute.xlu0 %708 }
  0x9b   : > { %v717_v31 = vsel %vm716_vm5, %v709_v28, %v711_v27 }
  0x9c   : > { %v724_v36 = vsel %vm284_vm0, %v717_v31, 0 }
  0x9e   : > { %v423_v29 = vpop.permute.xlu1 %422  ;;  %v713_v30 = vpop.permute.xlu0 %712 }
  0x9f   : > { %v427_v32 = vsel %vm424_vm3, %v421_v14, %v423_v29  ;;  %v718_v33 = vsel %vm716_vm5, %v711_v27, %v713_v30  ;;  %v2068_v29 = vld [vmem:[%s2468_s1 + $0x40] sm:$0xff]  }
  0xa0   : > { %v438_v34 = vsel %vm284_vm0, %v427_v32, 0  ;;  %1826 = vmatprep.subr.msk.bf16.mxu0 %vm284_vm0, %v718_v33 }
  0xa1   : > { %1914 = vmatpush3.bf16.msra.mxu1 %v438_v34 }
  0xa2   : > { %v857_v37 = vpop.permute.xlu1 %856  ;;  %v855_v38 = vpop.permute.xlu0 %854  ;;  %1919 = vmatprep.subr.bf16.mxu1 %v2143_v1 }
  0xa3   : > { %v863_v46 = vsel %vm862_vm6, %v855_v38, %v857_v37 }
  0xa4   : > { %1916 = vmatmul.mubr.msk.bf16.vlgmr.msra.gmra.mrb[4].mxu1 %vm280_vm1, %v2060_v21  ;;  %1817 = vmatmul.mubr.msk.bf16.vlgmr.msra.gmra.mrb[0].mxu0 %vm280_vm1, %v2062_v35  ;;  %v870_v50 = vsel %vm284_vm0, %v863_v46, 0 }
  0xa5   : > { %733 = vmatpush1.bf16.msra.mxu0 %v724_v36  ;;  %1921 = vmatprep.mubr.msk.bf16.mxu1 %vm2145_vm2, %v2143_v1 }
  0xa6   : > { %v569_v39 = vpop.permute.xlu1 %568  ;;  %v859_v40 = vpop.permute.xlu0 %858  ;;  %764 = vmatprep.mubr.bf16.mxu0 %v2142_v0 }
  0xa7   : > { %v573_v41 = vsel %vm570_vm4, %v567_v22, %v569_v39  ;;  %v864_v42 = vsel %vm862_vm6, %v857_v37, %v859_v40 }
  0xa8   : > { %v584_v43 = vsel %vm284_vm0, %v573_v41, 0  ;;  %1836 = vmatprep.subr.msk.bf16.mxu0 %vm284_vm0, %v864_v42 }
  0xa9   : > { %1920 = vmatpush3.bf16.msra.mxu1 %v584_v43 }
  0xaa   : > { %v715_v44 = vpop.permute.xlu0 %714  ;;  %1925 = vmatprep.subr.bf16.mxu1 %v2143_v1  ;;  %v1001_v45 = vpop.permute.xlu1 %1000 }
  0xab   : > { %v719_v47 = vsel %vm716_vm5, %v713_v30, %v715_v44 }
  0xac   : > { %v730_v48 = vsel %vm284_vm0, %v719_v47, 0  ;;  %1922 = vmatmul.mubr.msk.bf16.vlgmr.msra.gmra.mrb[8].mxu1 %vm280_vm1, %v2062_v35 }
  0xad   : > { %1926 = vmatpush3.bf16.msra.mxu1 %v730_v48  ;;  %1927 = vmatprep.mubr.msk.bf16.mxu1 %vm2145_vm2, %v2143_v1 }
  0xae   : > { %v1003_v51 = vpop.permute.xlu0 %1002  ;;  %1931 = vmatprep.subr.bf16.mxu1 %v2143_v1  ;;  %v1005_v52 = vpop.permute.xlu1 %1004 }
  0xaf   : > { %v1010_v53 = vsel %vm1008_vm7, %v1003_v51, %v1005_v52  ;;  %v1009_v60 = vsel %vm1008_vm7, %v1001_v45, %v1003_v51 }
  0xb0   : > { %1827 = vmatmul.mubr.msk.bf16.vlgmr.msra.gmra.mrb[0].mxu0 %vm280_vm1, %v2063_v49  ;;  %v1016_v62 = vsel %vm284_vm0, %v1009_v60, 0 }
  0xb1   : > { %879 = vmatpush1.bf16.msra.mxu0 %v870_v50  ;;  %910 = vmatprep.mubr.bf16.mxu0 %v2142_v0 }
  0xb2   : > { %v861_v54 = vpop.permute.xlu0 %860  ;;  %v1147_v55 = vpop.permute.xlu1 %1146  ;;  %1846 = vmatprep.subr.msk.bf16.mxu0 %vm284_vm0, %v1010_v53 }
  0xb3   : > { %v865_v56 = vsel %vm862_vm6, %v859_v40, %v861_v54 }
  0xb4   : > { %1928 = vmatmul.mubr.msk.bf16.vlgmr.msra.gmra.mrb[12].mxu1 %vm280_vm1, %v2063_v49  ;;  %v876_v57 = vsel %vm284_vm0, %v865_v56, 0 }
  0xb5   : > { %1932 = vmatpush3.bf16.msra.mxu1 %v876_v57  ;;  %1933 = vmatprep.mubr.msk.bf16.mxu1 %vm2145_vm2, %v2143_v1 }
  0xb6   : > { %v1149_v58 = vpop.permute.xlu0 %1148  ;;  %1937 = vmatprep.subr.bf16.mxu1 %v2143_v1  ;;  %v1151_v59 = vpop.permute.xlu1 %1150 }
  0xb7   : > { %v1156_v5 = vsel %vm1154_vm8, %v1149_v58, %v1151_v59  ;;  %v1155_v13 = vsel %vm1154_vm8, %v1147_v55, %v1149_v58 }
  0xb8   : > { %v1162_v14 = vsel %vm284_vm0, %v1155_v13, 0 }
  0xba   : > { %v1007_v63 = vpop.permute.xlu0 %1006  ;;  %v1153_v2 = vpop.permute.xlu1 %1152 }
  0xbb   : > { %v1011_v3 = vsel %vm1008_vm7, %v1005_v52, %v1007_v63  ;;  %v1157_v8 = vsel %vm1154_vm8, %v1151_v59, %v1153_v2 }
  0xbc   : > { %1837 = vmatmul.mubr.msk.bf16.vlgmr.msra.gmra.mrb[0].mxu0 %vm280_vm1, %v2064_v61  ;;  %1934 = vmatmul.mubr.msk.bf16.vlgmr.msra.gmra.mrb[16].mxu1 %vm280_vm1, %v2064_v61  ;;  %v1022_v4 = vsel %vm284_vm0, %v1011_v3, 0  ;;  %v1168_v10 = vsel %vm284_vm0, %v1157_v8, 0 }
  0xbd   : > { %1025 = vmatpush1.bf16.msra.mxu0 %v1016_v62  ;;  %1938 = vmatpush3.bf16.msra.mxu1 %v1022_v4 }
  0xbe   : > { %1939 = vmatprep.mubr.msk.bf16.mxu1 %vm2145_vm2, %v2143_v1  ;;  %1056 = vmatprep.mubr.bf16.mxu0 %v2142_v0  ;;  %v1295_v6 = vpop.permute.xlu1 %1294  ;;  %v1293_v7 = vpop.permute.xlu0 %1292 }
  0xbf   : > { %1943 = vmatprep.subr.bf16.mxu1 %v2143_v1  ;;  %1856 = vmatprep.subr.msk.bf16.mxu0 %vm284_vm0, %v1156_v5  ;;  %v1301_v23 = vsel %vm1300_vm9, %v1293_v7, %v1295_v6 }
  0xc0   : > { %v1308_v26 = vsel %vm284_vm0, %v1301_v23, 0 }
  0xc2   : > { %v1299_v11 = vpop.permute.xlu1 %1298  ;;  %v1297_v12 = vpop.permute.xlu0 %1296 }
  0xc3   : > { %v1302_v17 = vsel %vm1300_vm9, %v1295_v6, %v1297_v12  ;;  %v1303_v18 = vsel %vm1300_vm9, %v1297_v12, %v1299_v11 }
  0xc4   : > { %1940 = vmatmul.mubr.msk.bf16.vlgmr.msra.gmra.mrb[20].mxu1 %vm280_vm1, %v2065_v9  ;;  %v1314_v20 = vsel %vm284_vm0, %v1303_v18, 0 }
  0xc5   : > { %1944 = vmatpush3.bf16.msra.mxu1 %v1168_v10  ;;  %1945 = vmatprep.mubr.msk.bf16.mxu1 %vm2145_vm2, %v2143_v1 }
  0xc6   : > { %1949 = vmatprep.subr.bf16.mxu1 %v2143_v1  ;;  %v1441_v15 = vpop.permute.xlu1 %1440  ;;  %v1439_v16 = vpop.permute.xlu0 %1438 }
  0xc7   : > { %v1447_v30 = vsel %vm1446_vm10, %v1439_v16, %v1441_v15 }
  0xc8   : > { %1847 = vmatmul.mubr.msk.bf16.vlgmr.msra.gmra.mrb[0].mxu0 %vm280_vm1, %v2065_v9  ;;  %v1454_v31 = vsel %vm284_vm0, %v1447_v30, 0 }
  0xc9   : > { %1171 = vmatpush1.bf16.msra.mxu0 %v1162_v14  ;;  %1202 = vmatprep.mubr.bf16.mxu0 %v2142_v0 }
  0xca   : > { %1866 = vmatprep.subr.msk.bf16.mxu0 %vm284_vm0, %v1302_v17  ;;  %v1445_v21 = vpop.permute.xlu1 %1444  ;;  %v1443_v22 = vpop.permute.xlu0 %1442 }
  0xcb   : > { %v1449_v24 = vsel %vm1446_vm10, %v1443_v22, %v1445_v21  ;;  %v1448_v28 = vsel %vm1446_vm10, %v1441_v15, %v1443_v22 }
  0xcc   : > { %1946 = vmatmul.mubr.msk.bf16.vlgmr.msra.gmra.mrb[24].mxu1 %vm280_vm1, %v2066_v19  ;;  %v1460_v27 = vsel %vm284_vm0, %v1449_v24, 0 }
  0xcd   : > { %1950 = vmatpush3.bf16.msra.mxu1 %v1314_v20  ;;  %1951 = vmatprep.mubr.msk.bf16.mxu1 %vm2145_vm2, %v2143_v1  ;;  %v1590_v20 = vlaneseq }
  0xce   : > { %1955 = vmatprep.subr.bf16.mxu1 %v2143_v1 }
  0xcf   : > { %v1591_v21 = vshrl.u32 %v1590_v20, 7 }
  0xd1   : > { %v1592_v23 = vsub.s32 0, %v1591_v21  ;;  %v1596_v24 = vsub.s32 1, %v1591_v21 }
  0xd4   : > { %1857 = vmatmul.mubr.msk.bf16.vlgmr.msra.gmra.mrb[0].mxu0 %vm280_vm1, %v2066_v19  ;;  %1952 = vmatmul.mubr.msk.bf16.vlgmr.msra.gmra.mrb[28].mxu1 %vm280_vm1, %v2067_v25 }
  0xd5   : > { %1317 = vmatpush1.bf16.msra.mxu0 %v1308_v26  ;;  %1956 = vmatpush3.bf16.msra.mxu1 %v1460_v27 }
  0xd6   : > { %1957 = vmatprep.mubr.msk.bf16.mxu1 %vm2145_vm2, %v2143_v1  ;;  %1348 = vmatprep.mubr.bf16.mxu0 %v2142_v0 }
  0xd7   : > { %1876 = vmatprep.subr.msk.bf16.mxu0 %vm284_vm0, %v1448_v28  ;;  %v1588_v28 = vld [vmem:[%s2470_s3] sm:$0x7] }
  0xdb   : > { %v1569_v22 = vpop.permute.xlu0 %1568 }
  0xdc   : > { %1958 = vmatmul.mubr.msk.bf16.vlgmr.msra.gmra.mrb[32].mxu1 %vm280_vm1, %v2068_v29 }
  0xe0   : > { %1867 = vmatmul.mubr.msk.bf16.vlgmr.msra.gmra.mrb[0].mxu0 %vm280_vm1, %v2067_v25  ;;  %v1574_v25 = vpop.permute.xlu1 %1573 }
  0xe1   : > { %1463 = vmatpush1.bf16.msra.mxu0 %v1454_v31  ;;  %1494 = vmatprep.mubr.bf16.mxu0 %v2142_v0  ;;  %v1593_v31 = vrot.slane %v1588_v28, %v1592_v23 }
  0xe2   : > { %1961 = vmatprep.subr.bf16.mxu0 %v2143_v1 }
  0xec   : > { %1877 = vmatmul.mubr.msk.bf16.vlgmr.msra.gmra.mrb[0].mxu0 %vm280_vm1, %v2068_v29  ;;  %v1600_v29 = vsub.s32 2, %v1591_v21 }
  0xed   : > { %1963 = vmatprep.mubr.msk.bf16.mxu0 %vm2145_vm2, %v2143_v1 }
  0xf4   : > { %v371_v32 = vpop.f32.mrb[0].mxu1 }
  0xf5   : > { %v1911_v33 = vpop.f32.mrb[1].mxu1 }
  0xf6   : > { %v374_v34 = vpop.f32.mrb[2].mxu1 }
  0xf7   : > { %v1912_v35 = vpop.f32.mrb[3].mxu1 }
  0xf8   : > { %v1597_v35 = vrot.slane %v1588_v28, %v1596_v24 }
 0x177   : > { %v517_v36 = vpop.f32.mrb[4].mxu1 }
 0x178   : > { %v526_v37 = vadd.f32 %v517_v36, %v371_v32  ;;  %v1917_v38 = vpop.f32.mrb[5].mxu1 }
 0x179   : > { %v520_v39 = vpop.f32.mrb[6].mxu1 }
 0x17a   : > { %v529_v40 = vadd.f32 %v520_v39, %v374_v34  ;;  %v1918_v41 = vpop.f32.mrb[7].mxu1 }
 0x17f   : > { %v663_v42 = vpop.f32.mrb[8].mxu1 }
 0x180   : > { %v672_v43 = vadd.f32 %v663_v42, %v526_v37  ;;  %v1923_v0 = vpop.f32.mrb[9].mxu1 }
 0x181   : > { %v666_v44 = vpop.f32.mrb[10].mxu1 }
 0x182   : > { %v675_v45 = vadd.f32 %v666_v44, %v529_v40  ;;  %v1924_v46 = vpop.f32.mrb[11].mxu1 }
 0x187   : > { %v809_v47 = vpop.f32.mrb[12].mxu1 }
 0x188   : > { %v818_v48 = vadd.f32 %v809_v47, %v672_v43  ;;  %v1929_v49 = vpop.f32.mrb[13].mxu1  ;;  %v1601_v43 = vrot.slane %v1588_v28, %v1600_v29 }
 0x189   : > { %v812_v1 = vpop.f32.mrb[14].mxu1 }
 0x18a   : > { %v821_v50 = vadd.f32 %v812_v1, %v675_v45  ;;  %v1930_v51 = vpop.f32.mrb[15].mxu1 }
 0x18f   : > { %v955_v52 = vpop.f32.mrb[16].mxu1 }
 0x190   : > { %v964_v53 = vadd.f32 %v955_v52, %v818_v48  ;;  %v1935_v54 = vpop.f32.mrb[17].mxu1 }
 0x191   : > { %v958_v55 = vpop.f32.mrb[18].mxu1 }
 0x192   : > { %v967_v56 = vadd.f32 %v958_v55, %v821_v50  ;;  %v1936_v57 = vpop.f32.mrb[19].mxu1 }
 0x197   : > { %v1101_v58 = vpop.f32.mrb[20].mxu1 }
 0x198   : > { %v1110_v59 = vadd.f32 %v1101_v58, %v964_v53  ;;  %v1941_v60 = vpop.f32.mrb[21].mxu1 }
 0x199   : > { %v1104_v61 = vpop.f32.mrb[22].mxu1  ;;  %v2069_v60 = vld [vmem:[%s2471_s4] sm:$0xff]  }
 0x19a   : > { %v1113_v62 = vadd.f32 %v1104_v61, %v967_v56  ;;  %v1942_v63 = vpop.f32.mrb[23].mxu1  ;;  %v1624_v61 = vld [vmem:[%s2472_s5] sm:$0xff] }
 0x19b   : > { %v1625_v63 = vld [vmem:[%s2472_s5 + $0x8] sm:$0xff] }
 0x19f   : > { %v1247_v2 = vpop.f32.mrb[24].mxu1 }
 0x1a0   : > { %v1256_v3 = vadd.f32 %v1247_v2, %v1110_v59  ;;  %v1947_v4 = vpop.f32.mrb[25].mxu1 }
 0x1a1   : > { %v1250_v5 = vpop.f32.mrb[26].mxu1 }
 0x1a2   : > { %v1259_v6 = vadd.f32 %v1250_v5, %v1113_v62  ;;  %v1948_v7 = vpop.f32.mrb[27].mxu1 }
 0x1a7   : > { %v1393_v8 = vpop.f32.mrb[28].mxu1 }
 0x1a8   : > { %v1402_v9 = vadd.f32 %v1393_v8, %v1256_v3  ;;  %v1953_v10 = vpop.f32.mrb[29].mxu1 }
 0x1a9   : > { %v1396_v11 = vpop.f32.mrb[30].mxu1 }
 0x1aa   : > { %v1405_v12 = vadd.f32 %v1396_v11, %v1259_v6  ;;  %v1954_v13 = vpop.f32.mrb[31].mxu1 }
 0x1af   : > { %v1539_v14 = vpop.f32.mrb[32].mxu1 }
 0x1b0   : > { %v1548_v15 = vadd.f32 %v1539_v14, %v1402_v9  ;;  %v1959_v16 = vpop.f32.mrb[33].mxu1 }
 0x1b1   : > { %v1542_v17 = vpop.f32.mrb[34].mxu1 }
 0x1b2   : > { %v1551_v18 = vadd.f32 %v1542_v17, %v1405_v12  ;;  %v1960_v19 = vpop.f32.mrb[35].mxu1  ;;  %v2387_v26 = vadd.f32 %v1569_v22, %v1548_v15 }
 0x1b4   : > { %v2394_v33 = vadd.f32 %v1574_v25, %v1551_v18  ;;  %v1584_v40 = vmax.f32 %v2387_v26, 0.0 }
 0x1b6   : > { %v1587_v45 = vmax.f32 %v2394_v33, 0.0  ;;  %v1607_v1 = vmul.f32 %v1601_v43, %v1584_v40 }
 0x1b8   : > { %v1610_v52 = vmul.f32 %v1601_v43, %v1587_v45 }
 0x1bf   : > { %v1496_v27 = vpop.f32.mrb[0].mxu0 }
 0x1c0   : > { %v2392_v30 = vadd.f32 %v1569_v22, %v1496_v27  ;;  %v1498_v32 = vpop.f32.mrb[1].mxu0 }
 0x1c1   : > { %v2396_v34 = vadd.f32 %v1569_v22, %v1498_v32  ;;  %v1500_v36 = vpop.f32.mrb[2].mxu0 }
 0x1c2   : > { %v1582_v37 = vmax.f32 %v2392_v30, 0.0  ;;  %v2399_v38 = vadd.f32 %v1574_v25, %v1500_v36  ;;  %v1502_v39 = vpop.f32.mrb[3].mxu0 }
 0x1c3   : > { %v1583_v41 = vmax.f32 %v2396_v34, 0.0  ;;  %v2403_v42 = vadd.f32 %v1574_v25, %v1502_v39 }
 0x1c4   : > { %v1605_v0 = vmul.f32 %v1593_v31, %v1582_v37  ;;  %v1585_v44 = vmax.f32 %v2399_v38, 0.0 }
 0x1c5   : > { %v1606_v46 = vmul.f32 %v1597_v35, %v1583_v41  ;;  %v1586_v47 = vmax.f32 %v2403_v42, 0.0 }
 0x1c6   : > { %v1608_v48 = vmul.f32 %v1593_v31, %v1585_v44 }
 0x1c7   : > { %v1609_v49 = vmul.f32 %v1597_v35, %v1586_v47  ;;  %v1611_v50 = vadd.f32 %v1606_v46, %v1605_v0 }
 0x1c9   : > { %v1612_v51 = vadd.f32 %v1611_v50, %v1607_v1  ;;  %v1615_v53 = vadd.f32 %v1609_v49, %v1608_v48 }
 0x1cb   : > { %1613 = vadd.xlane.f32.xlu1 %v1612_v51  ;;  %v1616_v54 = vadd.f32 %v1615_v53, %v1610_v52 }
 0x1cd   : > { %1617 = vadd.xlane.f32.xlu0 %v1616_v54 }
 0x258   : > { %v1614_v55 = vpop.xlane.xlu1 %1613 }
 0x259   : > { %v1619_v57 = vmul.f32 0.00390625, %v1614_v55 }
 0x25a   : > { %v1618_v56 = vpop.xlane.xlu0 %1617 }
 0x25b   : > { %v1620_v58 = vmul.f32 0.00390625, %v1618_v56 }
 0x25d   : > { %v1623_v59 = vpack.c.bf16 %v1620_v58, %v1619_v57 }
 0x25f   : > { %1962 = vmatpush3.bf16.msra.mxu0 %v1623_v59 }
 0x262   : > { %1964 = vmatmul.mubr.msk.bf16.vlgmr.msra.gmra.mrb[4].mxu0 %vm1631_vm11, %v2069_v60 }
 0x335   : > { %v1669_v62 = vpop.f32.mrb[4].mxu0 }
 0x336   : > { %v1670_v2 = vadd.f32 %v1669_v62, %v1624_v61  ;;  %v1965_v3 = vpop.f32.mrb[5].mxu0 }
 0x337   : > { %v1672_v4 = vpop.f32.mrb[6].mxu0 }
 0x338   : > { %v1881_v5 = vmul.f32 -1.442695, %v1670_v2  ;;  %v1673_v6 = vadd.f32 %v1672_v4, %v1625_v63  ;;  %v1966_v7 = vpop.f32.mrb[7].mxu0 }
 0x33a   : > { %2070 = vpow2.f32 %v1881_v5  ;;  %v1882_v8 = vmul.f32 -1.442695, %v1673_v6 }
 0x33c   : > { %2072 = vpow2.f32 %v1882_v8 }
 0x344   : > { %v2071_v9 = vpop.eup %2070 }
 0x345   : > { %v1682_v10 = vadd.f32 1.0, %v2071_v9 }
 0x346   : > { %v2073_v11 = vpop.eup %2072 }
 0x347   : > { %2074 = vrcp.f32 %v1682_v10  ;;  %v1683_v12 = vadd.f32 1.0, %v2073_v11 }
 0x349   : > { %2076 = vrcp.f32 %v1683_v12 }
 0x351   : > { %v2075_v13 = vpop.eup %2074 }
 0x352   : > { %1690 = vperm.xlu0 %2053, %v2075_v13  }
 0x353   : > { %v2077_v14 = vpop.eup %2076 }
 0x354   : > { %1695 = vperm.xlu1 %2054, %v2077_v14  }
 0x3d1   : > { %v1691_v15 = vpop.permute.xlu0 %1690 }
 0x3d2   : > { %v1698_v16 = vmul.f32 %v1691_v15, %v1582_v37  ;;  %v1699_v17 = vmul.f32 %v1691_v15, %v1583_v41  ;;  %v1700_v18 = vmul.f32 %v1691_v15, %v1584_v40 }
 0x3d3   : > { %v1696_v19 = vpop.permute.xlu1 %1695 }
 0x3d4   : > { %1704 = vst [vmem:[%s244_s9] sm:$0xff] %v1698_v16  ;;  %1705 = vst [vmem:[%s244_s9 + $0x8] sm:$0xff] %v1699_v17  ;;  %v1701_v20 = vmul.f32 %v1696_v19, %v1585_v44  ;;  %v1702_v21 = vmul.f32 %v1696_v19, %v1586_v47  ;;  %v1703_v22 = vmul.f32 %v1696_v19, %v1587_v45 }
 0x3d5   : > { %1706 = vst [vmem:[%s244_s9 + $0x10] sm:$0xff] %v1700_v18 }
 0x3d6   : > { %1707 = vst [vmem:[%s244_s9 + $0x18] sm:$0xff] %v1701_v20  ;;  %1708 = vst [vmem:[%s244_s9 + $0x20] sm:$0xff] %v1702_v21 }
 0x3d7   : > { %1709 = vst [vmem:[%s244_s9 + $0x28] sm:$0xff] %v1703_v22 }
 0x3d8   : > { %2091 = shalt.err (!%p2088_p3)
}
 0x3d9   : > { %s2092_s19 = scalar_lea.hbm %s2424_s25, 768  ;;  %s2096_s28 = scalar_lea.hbm %s2473_s6, 1536 }
 0x3da   : > { %p2093_p4 = scmp.ne.s32.totalorder %s2424_s25, %s2092_s19  ;;  %p2097_p9 = scmp.lt.u32.totalorder %s2424_s25, %s2473_s6 }
 0x3db   : > { %p2098_p10 = scmp.lt.u32.totalorder %s2096_s28, %s2092_s19  ;;  %p2100_p12 = scmp.lt.u32.totalorder %s2092_s19, %s2424_s25 }
 0x3dc   : > { %p2094_p7 = pnand %p2093_p4, %p2229_p5 }
 0x3dd   : > { %p2099_p11 = por %p2098_p10, %p2097_p9 }
 0x3de   : > { %p2095_p8 = pneg %p2094_p7 }
 0x3df   : > { %p2101_p13 = por %p2100_p12, %p2099_p11 }
 0x3e1   : > { %p2102_p0 = pnand %p2101_p13, %p2095_p8 }
 0x3e3   : > { %2105 = shalt.err (!%p2102_p0)
}
 0x3e4   : > { %s2154_s11 = smov 384   ;;  %s2155_s12 = smov 24  }
 0x3e5   : > { %2001 = dma.vmem_to_hbm [thread:$0]  (%p2229_p5), %s2419_s10, 768, %s2424_s25, %s2426_s14, %s2154_s11, %s2154_s11, %s2155_s12  }
 0x3e6 PF: > { %p2007_p1 = scmp.ge.s32.totalorder %s2140_s24, 2  ;;  %s1739_s13 = sand.u32 1, %s2128_s21  }
 0x3e7   : > { %s1740_s15 = scalar_lea.sflag [#allocation4], %s1739_s13 }
 0x3e8   : > { %p2004_p2 = pnand %p2007_p1, %p2233_p6 }
 0x3ea   : > { %2123 = dma.done.wait (!%p2004_p2), %s1740_s15, 768  }
 0x3eb   : > { %2125 = vsyncadd (!%p2004_p2), %s1740_s15, 4294966528  ;;  %p16_p3 = scmp.ge.s32.totalorder %s2216_s27, 4   ;;  %s2476_s21 = smov %s2132_s22 }
 0x3ec   : > { %s2477_s22 = smov %s2136_s23  ;;  %s2478_s23 = smov %s2227_s30 }
 0x3ed   : > { %s2479_s24 = smov %s2216_s27  ;;  %18 = sbr.rel (!%p16_p3) target bundleno = 3 (0x3), region = 87 }
 0x3f4   :  { %1745 = vsyncpa [#allocation4], 1 }
 0x3f5   :  { %1747 = vsyncpa [#allocation4 + $0x1], 1 }

</bundles_post_ra>
